<compile_context>
chip_gen: v7x
topology: tpu7x:2x2x1
jax: 0.10.0
libtpu: 0.0.40
codegen_flags: <defaults>
</compile_context>

<pallas_src>
import functools

import jax
import jax.numpy as jnp
import numpy as np
from jax import lax
from jax.experimental import pallas as pl
from jax.experimental.pallas import tpu as pltpu


# ----------------------------------------------------------------------------
# Pallas kernel: grid = (2,) over direction; full time loop runs inside.
# ----------------------------------------------------------------------------
def _bigru_kernel(x_ref, wih_ref, whh_ref, bx_ref, bhn_ref, o_ref, h_ref,
                  *, matmul_dtype):
    # x_ref   : (T, B, I)   time-major input, shared by both directions
    # wih_ref : (I, 3H)     this direction's input weights,  gates [r | z | n]
    # whh_ref : (H, 3H)     this direction's hidden weights, gates [r | z | n]
    # bx_ref  : (1, 3H)     pre-folded biases [b_ir+b_hr | b_iz+b_hz | b_in]
    # bhn_ref : (1, H)      b_hn (must stay inside the r * (...) term)
    # o_ref   : (T, B, H)   this direction's output (time-major)
    # h_ref   : (B, H) f32  hidden-state carry (VMEM scratch)
    d = pl.program_id(0)                  # 0 = forward, 1 = backward
    T, B, _ = x_ref.shape
    H = bhn_ref.shape[-1]

    # Hoist weight / bias loads and bias broadcasts out of the time loop.
    wih = wih_ref[...].astype(matmul_dtype)                     # (I, 3H)
    whh = whh_ref[...].astype(matmul_dtype)                     # (H, 3H)
    bx = jnp.broadcast_to(bx_ref[...], (B, 3 * H)).astype(jnp.float32)
    bhn = jnp.broadcast_to(bhn_ref[...], (B, H)).astype(jnp.float32)

    h_ref[...] = jnp.zeros((B, H), jnp.float32)

    def step(s, carry):
        # Forward direction walks t = 0..T-1, backward walks t = T-1..0.
        t = jnp.where(d == 0, s, T - 1 - s)

        x_t = x_ref[t].astype(matmul_dtype)                     # (B, I)
        h_prev = h_ref[...]                                     # (B, H) f32

        # One fused dot per operand (3 gates concatenated on the output axis).
        gi = jnp.dot(x_t, wih, preferred_element_type=jnp.float32) + bx     # (B, 3H)
        gh = jnp.dot(h_prev.astype(matmul_dtype), whh,
                     preferred_element_type=jnp.float32)                     # (B, 3H)

        r = jax.nn.sigmoid(gi[:, 0:H] + gh[:, 0:H])
        z = jax.nn.sigmoid(gi[:, H:2 * H] + gh[:, H:2 * H])
        n = jnp.tanh(gi[:, 2 * H:3 * H] + r * (gh[:, 2 * H:3 * H] + bhn))
        h_new = (1.0 - z) * n + z * h_prev

        h_ref[...] = h_new
        o_ref[t] = h_new.astype(o_ref.dtype)
        return carry

    lax.fori_loop(0, T, step, 0)


# ----------------------------------------------------------------------------
# Module wrapper (glue in plain JAX): Bidirectional_GRU.forward
# ----------------------------------------------------------------------------
def bidirectional_gru(x, params, *, matmul_dtype=jnp.float32):
    """x: (B, T, input_size) float32 -> (B, T, 2*hidden_size) float32."""
    B, T, I = x.shape
    H = params["whh"].shape[1]

    x_tbi = jnp.transpose(x, (1, 0, 2))                         # (T, B, I)

    # Fold r/z biases host-side: b_x = bih + [bhh_r, bhh_z, 0]; keep b_hn apart.
    bih, bhh = params["bih"], params["bhh"]
    b_x = (bih.at[:, : 2 * H].add(bhh[:, : 2 * H]))[:, None, :]  # (2, 1, 3H)
    b_hn = bhh[:, None, 2 * H:]                                  # (2, 1, H)

    kernel = functools.partial(_bigru_kernel, matmul_dtype=matmul_dtype)

    out = pl.pallas_call(
        kernel,
        out_shape=jax.ShapeDtypeStruct((2, T, B, H), jnp.float32),
        grid_spec=pltpu.PrefetchScalarGridSpec(
            num_scalar_prefetch=0,
            grid=(2,),                                           # direction axis
            in_specs=[
                # Same block for both directions -> x stays resident in VMEM.
                pl.BlockSpec((T, B, I), lambda d: (0, 0, 0)),
                pl.BlockSpec((None, I, 3 * H), lambda d: (d, 0, 0)),
                pl.BlockSpec((None, H, 3 * H), lambda d: (d, 0, 0)),
                pl.BlockSpec((None, 1, 3 * H), lambda d: (d, 0, 0)),
                pl.BlockSpec((None, 1, H), lambda d: (d, 0, 0)),
            ],
            out_specs=pl.BlockSpec((None, T, B, H), lambda d: (d, 0, 0, 0)),
            scratch_shapes=[pltpu.VMEM((B, H), jnp.float32)],
        ),
        compiler_params=pltpu.CompilerParams(
            # Directions are independent: "parallel" shards them across the two
            # TensorCores on v7x; on v5e/v6e it simply runs both sequentially.
            dimension_semantics=("parallel",),
            # NOTE: at real DeepSpeech2 shapes, size a T-chunk grid axis against
            # VMEM (v7x: 64 MiB) and set vmem_limit_bytes explicitly.
        ),
    )(x_tbi, params["wih"], params["whh"], b_x, b_hn)

    # (2, T, B, H) -> (B, T, 2H): forward in [..., :H], backward in [..., H:].
    out = jnp.transpose(out, (2, 1, 0, 3)).reshape(B, T, 2 * H)
    # Dropout(0.5) in eval mode is identity.
    return out


# ----------------------------------------------------------------------------
# Deterministic parameter init (PyTorch-style uniform(-1/sqrt(H), 1/sqrt(H))).
# Weights are stored pre-transposed with gates concatenated: (2, in_dim, 3H),
# gate order [r | z | n]; index 0 = forward direction, 1 = backward.
# ----------------------------------------------------------------------------
def init_params(key, input_size, hidden_size):
    k = 1.0 / np.sqrt(hidden_size)
    keys = jax.random.split(key, 4)

    def u(kk, shape):
        return jax.random.uniform(kk, shape, jnp.float32, minval=-k, maxval=k)

    return {
        "wih": u(keys[0], (2, input_size, 3 * hidden_size)),
        "whh": u(keys[1], (2, hidden_size, 3 * hidden_size)),
        "bih": u(keys[2], (2, 3 * hidden_size)),
        "bhh": u(keys[3], (2, 3 * hidden_size)),
    }


# ----------------------------------------------------------------------------
# Pure-JAX reference (lax.scan) to verify the kernel.
# ----------------------------------------------------------------------------
def bidirectional_gru_ref(x, params):
    B, T, _ = x.shape
    H = params["whh"].shape[1]
    x_tbi = jnp.transpose(x, (1, 0, 2))

    def run_dir(d, reverse):
        wih = params["wih"][d]   # (I, 3H)
        whh = params["whh"][d]   # (H, 3H)
        bih = params["bih"][d]   # (3H,)
        bhh = params["bhh"][d]   # (3H,)
        xs = x_tbi[::-1] if reverse else x_tbi
        h0 = jnp.zeros((B, H), jnp.float32)

        def step(h, x_t):
            gi = x_t @ wih + bih
            gh = h @ whh + bhh
            r = jax.nn.sigmoid(gi[:, :H] + gh[:, :H])
            z = jax.nn.sigmoid(gi[:, H:2 * H] + gh[:, H:2 * H])
            n = jnp.tanh(gi[:, 2 * H:] + r * gh[:, 2 * H:])
            h_new = (1.0 - z) * n + z * h
            return h_new, h_new

        _, hs = lax.scan(step, h0, xs)
        if reverse:
            hs = hs[::-1]
        return hs  # (T, B, H)

    f = run_dir(0, False)
    b = run_dir(1, True)
    return jnp.transpose(jnp.concatenate([f, b], axis=-1), (1, 0, 2))


if __name__ == "__main__":
    B, T, INPUT, HIDDEN = 2, 8, 16, 32

    key = jax.random.PRNGKey(0)
    kx, kp = jax.random.split(key)
    x = jax.random.normal(kx, (B, T, INPUT), jnp.float32)
    params = init_params(kp, INPUT, HIDDEN)

    out = jax.jit(bidirectional_gru)(x, params)
    out = jax.block_until_ready(out)

    ref = jax.block_until_ready(jax.jit(bidirectional_gru_ref)(x, params))

    assert out.shape == (B, T, 2 * HIDDEN), out.shape
    np.testing.assert_allclose(np.asarray(out), np.asarray(ref), atol=2e-5, rtol=2e-5)

    print("KERNEL_OK")
</pallas_src>

<mosaic_0001>
module attributes {stable_mosaic.version = 11 : i64} {
  func.func @_bigru_kernel(%arg0: i32, %arg1: memref<8x2x16xf32, #tpu.memory_space<vmem>>, %arg2: memref<1x16x96xf32, #tpu.memory_space<vmem>>, %arg3: memref<1x32x96xf32, #tpu.memory_space<vmem>>, %arg4: memref<1x1x96xf32, #tpu.memory_space<vmem>>, %arg5: memref<1x1x32xf32, #tpu.memory_space<vmem>>, %arg6: memref<1x8x2x32xf32, #tpu.memory_space<vmem>>, %arg7: memref<2x32xf32, #tpu.memory_space<vmem>>) attributes {dimension_semantics = [#tpu.dimension_semantics<parallel>], iteration_bounds = array<i64: 2>, scalar_prefetch = 0 : i64, scratch_operands = 1 : i64, tpu.core_type = #tpu.core_type<tc>, window_params = [{pipeline_mode = #tpu.pipeline_mode<synchronous>, transform_indices = @transform_0, window_bounds = array<i64: 8, 2, 16>}, {transform_indices = @transform_1, window_bounds = array<i64: 1, 16, 96>}, {transform_indices = @transform_2, window_bounds = array<i64: 1, 32, 96>}, {transform_indices = @transform_3, window_bounds = array<i64: 1, 1, 96>}, {transform_indices = @transform_4, window_bounds = array<i64: 1, 1, 32>}, {transform_indices = @transform_5, window_bounds = array<i64: 1, 8, 2, 32>}]} {
    %c0 = arith.constant 0 : index
    %c0_0 = arith.constant 0 : index
    %c0_1 = arith.constant 0 : index
    %0 = vector.load %arg2[%c0, %c0_0, %c0_1] : memref<1x16x96xf32, #tpu.memory_space<vmem>>, vector<1x16x96xf32>
    %1 = vector.shape_cast %0 : vector<1x16x96xf32> to vector<16x96xf32>
    %c0_2 = arith.constant 0 : index
    %c0_3 = arith.constant 0 : index
    %c0_4 = arith.constant 0 : index
    %2 = vector.load %arg3[%c0_2, %c0_3, %c0_4] : memref<1x32x96xf32, #tpu.memory_space<vmem>>, vector<1x32x96xf32>
    %3 = vector.shape_cast %2 : vector<1x32x96xf32> to vector<32x96xf32>
    %c0_5 = arith.constant 0 : index
    %c0_6 = arith.constant 0 : index
    %c0_7 = arith.constant 0 : index
    %4 = vector.load %arg4[%c0_5, %c0_6, %c0_7] : memref<1x1x96xf32, #tpu.memory_space<vmem>>, vector<1x1x96xf32>
    %5 = vector.shape_cast %4 : vector<1x1x96xf32> to vector<1x96xf32>
    %6 = vector.shape_cast %5 : vector<1x96xf32> to vector<1x96xf32>
    %7 = vector.broadcast %6 : vector<1x96xf32> to vector<2x96xf32>
    %c0_8 = arith.constant 0 : index
    %c0_9 = arith.constant 0 : index
    %c0_10 = arith.constant 0 : index
    %8 = vector.load %arg5[%c0_8, %c0_9, %c0_10] : memref<1x1x32xf32, #tpu.memory_space<vmem>>, vector<1x1x32xf32>
    %9 = vector.shape_cast %8 : vector<1x1x32xf32> to vector<1x32xf32>
    %10 = vector.shape_cast %9 : vector<1x32xf32> to vector<1x32xf32>
    %11 = vector.broadcast %10 : vector<1x32xf32> to vector<2x32xf32>
    %cst = arith.constant 0.000000e+00 : f32
    %12 = vector.broadcast %cst : f32 to vector<2x32xf32>
    %c0_11 = arith.constant 0 : index
    %c0_12 = arith.constant 0 : index
    %13 = vector.load %arg7[%c0_11, %c0_12] : memref<2x32xf32, #tpu.memory_space<vmem>>, vector<2x32xf32>
    tpu.vector_store %arg7[%c0_11, %c0_12], %12 {strides = array<i32>} : memref<2x32xf32, #tpu.memory_space<vmem>>, vector<2x32xf32>,
    %c0_i32 = arith.constant 0 : i32
    %c8_i32 = arith.constant 8 : i32
    %14 = arith.addi %c0_i32, %c8_i32 : i32
    %c1_i32 = arith.constant 1 : i32
    scf.for %arg8 = %c0_i32 to %14 step %c1_i32  : i32 {
      %c0_i32_14 = arith.constant 0 : i32
      %15 = arith.cmpi eq, %arg0, %c0_i32_14 : i32
      %c7_i32 = arith.constant 7 : i32
      %16 = arith.subi %c7_i32, %arg8 : i32
      %17 = arith.select %15, %arg8, %16 : i32
      %18 = arith.index_cast %17 : i32 to index
      %c0_15 = arith.constant 0 : index
      %c0_16 = arith.constant 0 : index
      %19 = vector.load %arg1[%18, %c0_15, %c0_16] : memref<8x2x16xf32, #tpu.memory_space<vmem>>, vector<1x2x16xf32>
      %20 = vector.shape_cast %19 : vector<1x2x16xf32> to vector<2x16xf32>
      %c0_17 = arith.constant 0 : index
      %c0_18 = arith.constant 0 : index
      %21 = vector.load %arg7[%c0_17, %c0_18] : memref<2x32xf32, #tpu.memory_space<vmem>>, vector<2x32xf32>
      %cst_19 = arith.constant dense<0.000000e+00> : vector<2x96xf32>
      %22 = tpu.matmul %20, %1, %cst_19 {dimension_numbers = #tpu.dot_dimension_numbers<[1], [0], [0], [1], [0, 0, 1, 1], [], []>} : vector<2x16xf32>, vector<16x96xf32>, vector<2x96xf32> -> vector<2x96xf32>
      %23 = arith.addf %22, %7 : vector<2x96xf32>
      %cst_20 = arith.constant dense<0.000000e+00> : vector<2x96xf32>
      %24 = tpu.matmul %21, %3, %cst_20 {dimension_numbers = #tpu.dot_dimension_numbers<[1], [0], [0], [1], [0, 0, 1, 1], [], []>} : vector<2x32xf32>, vector<32x96xf32>, vector<2x96xf32> -> vector<2x96xf32>
      %25 = vector.extract_strided_slice %23 {offsets = [0, 0], sizes = [2, 32], strides = [1, 1]} : vector<2x96xf32> to vector<2x32xf32>
      %26 = vector.extract_strided_slice %24 {offsets = [0, 0], sizes = [2, 32], strides = [1, 1]} : vector<2x96xf32> to vector<2x32xf32>
      %27 = arith.addf %25, %26 : vector<2x32xf32>
      %28 = arith.negf %27 : vector<2x32xf32>
      %29 = math.exp %28 : vector<2x32xf32>
      %cst_21 = arith.constant 1.000000e+00 : f32
      %30 = vector.broadcast %cst_21 : f32 to vector<2x32xf32>
      %31 = arith.addf %30, %29 : vector<2x32xf32>
      %32 = arith.divf %30, %31 : vector<2x32xf32>
      %33 = vector.extract_strided_slice %23 {offsets = [0, 32], sizes = [2, 32], strides = [1, 1]} : vector<2x96xf32> to vector<2x32xf32>
      %34 = vector.extract_strided_slice %24 {offsets = [0, 32], sizes = [2, 32], strides = [1, 1]} : vector<2x96xf32> to vector<2x32xf32>
      %35 = arith.addf %33, %34 : vector<2x32xf32>
      %36 = arith.negf %35 : vector<2x32xf32>
      %37 = math.exp %36 : vector<2x32xf32>
      %cst_22 = arith.constant 1.000000e+00 : f32
      %38 = vector.broadcast %cst_22 : f32 to vector<2x32xf32>
      %39 = arith.addf %38, %37 : vector<2x32xf32>
      %40 = arith.divf %38, %39 : vector<2x32xf32>
      %41 = vector.extract_strided_slice %23 {offsets = [0, 64], sizes = [2, 32], strides = [1, 1]} : vector<2x96xf32> to vector<2x32xf32>
      %42 = vector.extract_strided_slice %24 {offsets = [0, 64], sizes = [2, 32], strides = [1, 1]} : vector<2x96xf32> to vector<2x32xf32>
      %43 = arith.addf %42, %11 : vector<2x32xf32>
      %44 = arith.mulf %32, %43 : vector<2x32xf32>
      %45 = arith.addf %41, %44 : vector<2x32xf32>
      %46 = math.tanh %45 : vector<2x32xf32>
      %cst_23 = arith.constant 1.000000e+00 : f32
      %47 = vector.broadcast %cst_23 : f32 to vector<2x32xf32>
      %48 = arith.subf %47, %40 : vector<2x32xf32>
      %49 = arith.mulf %48, %46 : vector<2x32xf32>
      %50 = arith.mulf %40, %21 : vector<2x32xf32>
      %51 = arith.addf %49, %50 : vector<2x32xf32>
      %c0_24 = arith.constant 0 : index
      %c0_25 = arith.constant 0 : index
      %52 = vector.load %arg7[%c0_24, %c0_25] : memref<2x32xf32, #tpu.memory_space<vmem>>, vector<2x32xf32>
      tpu.vector_store %arg7[%c0_24, %c0_25], %51 {strides = array<i32>} : memref<2x32xf32, #tpu.memory_space<vmem>>, vector<2x32xf32>,
      %c0_26 = arith.constant 0 : index
      %53 = arith.index_cast %17 : i32 to index
      %c0_27 = arith.constant 0 : index
      %c0_28 = arith.constant 0 : index
      %54 = vector.load %arg6[%c0_26, %53, %c0_27, %c0_28] : memref<1x8x2x32xf32, #tpu.memory_space<vmem>>, vector<1x1x2x32xf32>
      %55 = vector.shape_cast %54 : vector<1x1x2x32xf32> to vector<2x32xf32>
      %56 = vector.shape_cast %51 : vector<2x32xf32> to vector<1x1x2x32xf32>
      tpu.vector_store %arg6[%c0_26, %53, %c0_27, %c0_28], %56 {strides = array<i32>} : memref<1x8x2x32xf32, #tpu.memory_space<vmem>>, vector<1x1x2x32xf32>,
    }
    %c8_i32_13 = arith.constant 8 : i32
    return
  }
  func.func @transform_0(%arg0: i32) -> (i32, i32, i32) {
    %c0_i32 = arith.constant 0 : i32
    %c0_i32_0 = arith.constant 0 : i32
    %c0_i32_1 = arith.constant 0 : i32
    %c0_i32_2 = arith.constant 0 : i32
    return %c0_i32, %c0_i32_0, %c0_i32_1 : i32, i32, i32
  }
  func.func @transform_1(%arg0: i32) -> (i32, i32, i32) {
    %c0_i32 = arith.constant 0 : i32
    %c0_i32_0 = arith.constant 0 : i32
    %c0_i32_1 = arith.constant 0 : i32
    return %arg0, %c0_i32, %c0_i32_0 : i32, i32, i32
  }
  func.func @transform_2(%arg0: i32) -> (i32, i32, i32) {
    %c0_i32 = arith.constant 0 : i32
    %c0_i32_0 = arith.constant 0 : i32
    %c0_i32_1 = arith.constant 0 : i32
    return %arg0, %c0_i32, %c0_i32_0 : i32, i32, i32
  }
  func.func @transform_3(%arg0: i32) -> (i32, i32, i32) {
    %c0_i32 = arith.constant 0 : i32
    %c0_i32_0 = arith.constant 0 : i32
    %c0_i32_1 = arith.constant 0 : i32
    return %arg0, %c0_i32, %c0_i32_0 : i32, i32, i32
  }
  func.func @transform_4(%arg0: i32) -> (i32, i32, i32) {
    %c0_i32 = arith.constant 0 : i32
    %c0_i32_0 = arith.constant 0 : i32
    %c0_i32_1 = arith.constant 0 : i32
    return %arg0, %c0_i32, %c0_i32_0 : i32, i32, i32
  }
  func.func @transform_5(%arg0: i32) -> (i32, i32, i32, i32) {
    %c0_i32 = arith.constant 0 : i32
    %c0_i32_0 = arith.constant 0 : i32
    %c0_i32_1 = arith.constant 0 : i32
    %c0_i32_2 = arith.constant 0 : i32
    return %arg0, %c0_i32, %c0_i32_0, %c0_i32_1 : i32, i32, i32, i32
  }
}

</mosaic_0001>

<bundles_post_ra>
// kernel: bidirectional_gru.1
= control target key start
LH: loop header
LB: loop body
LE: loop exit
PB: predicated region body
PF: predicated region fallthrough
CT: control target
= control target key end

     0   :  { %10 = vsyncpa [#allocation4], 0  ;;  %s1026_s0 = inlined_call_operand.vmem [shape: f32[8,2,16], index: 0, kind: input, shape index: {}]   ;;  %s1027_s1 = inlined_call_operand.hbm [shape: f32[2,16,96], index: 1, kind: input, shape index: {}]   ;;  %s1028_s2 = inlined_call_operand.vmem [shape: f32[2,32,96], index: 2, kind: input, shape index: {}]   ;;  %s1029_s3 = inlined_call_operand.vmem [shape: f32[2,1,96], index: 3, kind: input, shape index: {}]   ;;  %s1030_s4 = inlined_call_operand.vmem [shape: f32[2,1,32], index: 4, kind: input, shape index: {}]   ;;  %s1031_s5 = inlined_call_operand.vmem [shape: f32[2,8,2,32], index: 5, kind: output, shape index: {}]  }
   0x1   :  { %12 = vsyncpa [#allocation4 + $0x1], 0  ;;  %s855_s18 = smov 0   ;;  %s857_s19 = smov 0  }
   0x2   :  { %s859_s20 = smov 0   ;;  %s861_s21 = smov 0  }
   0x3 LB: > { %s874_s22 = sadd.s32 4294967295, %s809_s21   ;;  %s877_s23 = sadd.s32 1, %s809_s21   ;;  %s809_s21 = sphi %s861_s21, %s1040_s21   ;;  %s805_s20 = sphi %s859_s20, %s1039_s20   ;;  %s801_s19 = sphi %s857_s19, %s1038_s19   ;;  %s797_s18 = sphi %s855_s18, %s1037_s18  }
   0x4   : > { %s43_s24 = ssub.s32 %s809_s21, %s877_s23  ;;  %s46_s25 = sadd.s32 1, %s805_s20 }
   0x5   : > { %p44_p0 = scmp.eq.s32.totalorder %s43_s24, 0  ;;  %p53_p1 = scmp.ne.s32.totalorder %s805_s20, %s801_s19 }
   0x6   : > { %p54_p2 = scmp.eq.s32.totalorder %s809_s21, 0  ;;  %p59_p3 = scmp.ne.s32.totalorder %s801_s19, %s797_s18 }
   0x7   : > { %s887_s26 = scalar_select %p44_p0, %s805_s20, %s46_s25  }
   0x8   : > { %p55_p4 = por %p54_p2, %p53_p1  ;;  %p1032_p5 = scmp.eq.s32.totalorder %s874_s22, 0 }
   0x9   : > { %p685_p6 = scmp.lt.s32.totalorder %s809_s21, 2  ;;  %s190_s28 = sand.u32 1, %s805_s20  }
   0xa   : > { %p893_p7 = por %p1032_p5, %p59_p3  ;;  %s624_s29 = sshll.u32 %s190_s28, 4 }
   0xb   : > { %s641_s30 = sshll.u32 %s809_s21, 8  ;;  %s194_s9 = scalar_lea.vmem [#allocation3], %s624_s29 }
   0xc   : > { %s902_s8 = scalar_lea.hbm %s1027_s1, %s641_s30  ;;  %s201_s10 = sshll.u32 %s194_s9, 4  ;;  %s904_s10 = int_to_ptr.vmem [resolvable:$true] %s201_s10 }
   0xd   : > { %p906_p8 = pnand %p685_p6, %p55_p4  ;;  %s911_s12 = scalar_lea.sflag [#allocation4], %s190_s28 }
   0xe   : > { %s741_s13 = scalar_lea.hbm %s902_s8, 256  ;;  %s746_s16 = scalar_lea.hbm %s1027_s1, 512 }
   0xf   : > { %p742_p10 = scmp.ne.s32.totalorder %s902_s8, %s741_s13  ;;  %p743_p11 = pneg %p906_p8 }
  0x10   : > { %p747_p0 = scmp.lt.u32.totalorder %s902_s8, %s1027_s1  ;;  %p748_p1 = scmp.lt.u32.totalorder %s746_s16, %s741_s13 }
  0x11   : > { %p744_p12 = pnand %p743_p11, %p742_p10  ;;  %p750_p3 = scmp.lt.u32.totalorder %s741_s13, %s902_s8 }
  0x12   : > { %p749_p2 = por %p748_p1, %p747_p0 }
  0x13   : > { %p745_p13 = pneg %p744_p12 }
  0x14   : > { %p751_p4 = por %p750_p3, %p749_p2 }
  0x16   : > { %p752_p6 = pnand %p751_p4, %p745_p13 }
  0x18   : > { %755 = shalt.err (!%p752_p6)
}
  0x19   : > { %s756_s24 = scalar_lea.vmem %s904_s10, 256  ;;  %s815_s25 = smov [#allocation3]  }
  0x1a   : > { %p757_p10 = scmp.ne.s32.totalorder %s904_s10, %s756_s24  ;;  %s761_s28 = sshll.u32 %s815_s25, 4  ;;  %s762_s28 = int_to_ptr.vmem [resolvable:$false] %s761_s28 }
  0x1b   : > { %s763_s29 = scalar_lea.vmem %s762_s28, 512  ;;  %p764_p9 = scmp.lt.s32.totalorder %s904_s10, %s762_s28 }
  0x1c   : > { %p759_p12 = pnand %p757_p10, %p743_p11  ;;  %p765_p0 = scmp.lt.s32.totalorder %s763_s29, %s756_s24 }
  0x1e   : > { %p760_p5 = pneg %p759_p12  ;;  %p766_p1 = por %p765_p0, %p764_p9 }
  0x20   : > { %p767_p2 = pnand %p766_p1, %p760_p5 }
  0x22   : > { %770 = shalt.err (!%p767_p2)
}
  0x23   : > { %s816_s30 = smov 128   ;;  %s817_s6 = smov 8  }
  0x24   : > { %684 = dma.hbm_to_vmem [thread:$0]  (!%p906_p8), %s902_s8, 256, %s904_s10, %s911_s12, %s816_s30, %s816_s30, %s817_s6  }
  0x25   : > { %p229_p11 = scmp.lt.s32.totalorder %s809_s21, 3  ;;  %p1035_p13 = scmp.ge.s32.totalorder %s809_s21, 1 }
  0x27   : > { %p230_p3 = pnand %p1035_p13, %p229_p11 }
  0x28   : > { %s235_s7 = sand.u32 (!%p230_p3), 1, %s801_s19  }
  0x29   : > { %233 = sbr.rel (%p230_p3) target bundleno = 760 (0x2f8), region = 40  ;;  %s628_s9 = sshll.u32 (!%p230_p3), %s235_s7, 4 }
  0x2a   : > { %s236_s13 = scalar_lea.sflag (!%p230_p3), [#allocation4], %s235_s7  ;;  %s239_s14 = scalar_lea.vmem (!%p230_p3), [#allocation3], %s628_s9 }
  0x30   : > { %792 = dma.done.wait (%p893_p7), %s236_s13, 256  }
  0x31   : > { %794 = vsyncadd (%p893_p7), %s236_s13, 4294967040  ;;  %p277_p5 = scmp.lt.s32.totalorder %s874_s22, 1  ;;  %vm312_vm0 = vcmask 254976   ;;  %v818_v0 = vmov 0.0   ;;  %v964_v1 = vld [vmem:[%s239_s14] sm:$0xff]  ;;  %v966_v2 = vld [vmem:[%s239_s14 + $0x8] sm:$0xff] }
  0x32   : > { %313 = vst.msk [vmem:[#allocation2] sm:$0x3] %vm312_vm0, %v818_v0  ;;  %s980_s6 = smov 0  }
  0x33   : > { %s278_s21 = scalar_select %p277_p5, %s874_s22, 1 }
  0x35   : > { %s642_s8 = sshll.u32 %s278_s21, 5  ;;  %s284_s17 = scalar_lea.vmem %s1029_s3, %s278_s21 }
  0x36   : > { %s281_s12 = scalar_lea.vmem %s1028_s2, %s642_s8  ;;  %s287_s24 = scalar_lea.vmem %s1030_s4, %s278_s21  ;;  %v976_v7 = vld [vmem:[%s284_s17] ss:$0 sm:$0xff] }
  0x37   : > { %s643_s25 = sshll.u32 %s278_s21, 4  ;;  %v968_v3 = vld [vmem:[%s281_s12] sm:$0xff]  ;;  %v970_v4 = vld [vmem:[%s281_s12 + $0x8] sm:$0xff]  ;;  %v972_v5 = vld [vmem:[%s281_s12 + $0x10] sm:$0xff] }
  0x38   : > { %s962_s30 = scalar_lea.vmem %s1031_s5, %s643_s25  ;;  %v974_v6 = vld [vmem:[%s281_s12 + $0x18] sm:$0xff]  ;;  %v978_v8 = vld [vmem:[%s287_s24] ss:$0 sm:$0xff] }
  0x39 LB: >> { %v674_v9 = vpack.c.bf16 %v970_v4, %v968_v3  ;;  %v671_v10 = vpack.c.bf16 %v966_v2, %v964_v1  ;;  %v819_v11 = vmov 0.0|0.0   ;;  %v677_v12 = vpack.c.bf16 %v974_v6, %v972_v5  ;;  %s321_s7 = ssub.s32 7, %s813_s6  ;;  %p1036_p7 = scmp.eq.s32.totalorder %s874_s22, 0  ;;  %v326_v14 = vld [vmem:[#allocation2] sm:$0x3]  ;;  %s813_s6 = sphi %s980_s6, %s319_s6  }
  0x3a   : >> { %673 = vmatprep.subr.bf16.mxu1 %v819_v11  ;;  %670 = vmatprep.subr.bf16.mxu0 %v819_v11  ;;  %vm820_vm1 = vmmov 0   ;;  %v821_v13 = vmov 0.0   ;;  %s822_s13 = smov 64   ;;  %vm327_vm2 = vcmask 130048   ;;  %vm401_vm3 = vcmask 261120   ;;  %s823_s11 = smov 32  }
  0x3b   : >> { %675 = vmatpush3.bf16.msra.mxu1 %v674_v9  ;;  %672 = vmatpush3.bf16.msra.mxu0 %v671_v10  ;;  %s995_s9 = scalar_select %p1036_p7, %s813_s6, %s321_s7 }
  0x3c   : >> { %676 = vmatprep.subr.bf16.mxu1 %v819_v11  ;;  %656 = vmatprep.mubr.msk.f32.mxu0 %vm820_vm1, %v821_v13  ;;  %s824_s12 = smov 96   ;;  %s319_s6 = sadd.s32 1, %s813_s6  }
  0x3d   : >> { %667 = vmatprep.mubr.msk.f32.mxu1 %vm820_vm1, %v821_v13  ;;  %482 = vrot.lane.b32.xlu0 %v978_v8, %s822_s13  ;;  %s635_s14 = sshll.u32 %s995_s9, 1  ;;  %p316_p8 = scmp.ge.s32.totalorder %s319_s6, 8  }
  0x3e   : >> { %s324_s10 = scalar_lea.vmem %s1026_s0, %s635_s14  ;;  %s513_s15 = scalar_lea.vmem %s962_s30, %s635_s14 }
  0x3f   : >> { %678 = vmatpush3.bf16.msra.mxu1 %v677_v12  ;;  %v325_v15 = vld [vmem:[%s324_s10] sm:$0x3] }
  0x40   : >> { %657 = vmatmul.mubr.msk.f32.vlgmr.msra.gmra.mrb[0].mxu0 %vm327_vm2, %v325_v15 }
  0x42   : >> { %668 = vmatmul.mubr.msk.f32.vlgmr.msra.gmra.mrb[0].mxu1 %vm401_vm3, %v326_v14 }
  0xaf   : >> { %v483_v16 = vpop.permute.xlu0 %482 }
 0x113   : >> { %v397_v17 = vpop.f32.mrb[0].mxu0 }
 0x114   : >> { %v658_v19 = vpop.f32.mrb[1].mxu0  ;;  %v398_v22 = vadd.f32 %v976_v7, %v397_v17 }
 0x115   : >> { %v471_v18 = vpop.f32.mrb[0].mxu1 }
 0x116   : >> { %v485_v20 = vadd.f32 %v483_v16, %v471_v18  ;;  %v669_v21 = vpop.f32.mrb[1].mxu1  ;;  %v475_v23 = vadd.f32 %v471_v18, %v398_v22 }
 0x118   : >> { %487 = vrot.lane.b32.xlu0 %v485_v20, %s822_s13  ;;  %v638_v24 = vmul.f32 -1.442695, %v475_v23 }
 0x11a   : >> { %735 = vpow2.f32 %v638_v24 }
 0x11c   : >> { %503 = vrot.lane.b32.xlu0 %v326_v14, %s823_s11 }
 0x124   : >> { %v736_v25 = vpop.eup %735 }
 0x125   : >> { %v479_v26 = vadd.f32 1.0, %v736_v25 }
 0x127   : >> { %737 = vrcp.f32 %v479_v26 }
 0x131   : >> { %v738_v27 = vpop.eup %737 }
 0x132   : >> { %v497_v34 = vsub.f32 1.0, %v738_v27 }
 0x18a   : >> { %v488_v28 = vpop.permute.xlu0 %487 }
 0x18b   : >> { %v490_v29 = vmul.f32 %v738_v27, %v488_v28 }
 0x18d   : >> { %492 = vrot.lane.b32.xlu1 %v490_v29, %s822_s13 }
 0x18e   : >> { %v504_v33 = vpop.permute.xlu0 %503 }
 0x18f   : >> { %v506_v36 = vmul.f32 %v738_v27, %v504_v33 }
 0x1ff   : >> { %v493_v30 = vpop.permute.xlu1 %492 }
 0x200   : >> { %v495_v31 = vadd.f32 %v493_v30, %v398_v22 }
 0x202   : >> { %739 = vtanh.f32 %v495_v31 }
 0x20c   : >> { %v740_v32 = vpop.eup %739 }
 0x20d   : >> { %499 = vrot.lane.b32.xlu1 %v740_v32, %s824_s12 }
 0x27f   : >> { %v500_v35 = vpop.permute.xlu1 %499 }
 0x280   : >> { %v502_v37 = vmul.f32 %v500_v35, %v497_v34 }
 0x282   : >> { %v507_v38 = vadd.f32 %v506_v36, %v502_v37 }
 0x284   : >> { %509 = vrot.lane.b32.xlu1 %v507_v38, %s824_s12 }
 0x2f1   : > { %318 = sbr.rel (!%p316_p8) target bundleno = 57 (0x39), region = 98 }
 0x2f6   : >> { %v510_v39 = vpop.permute.xlu1 %509 }
 0x2f7   : >> { %512 = vst.msk [vmem:[#allocation2] sm:$0x3] %vm312_vm0, %v510_v39  ;;  %514 = vst.msk [vmem:[%s513_s15] sm:$0x3] %vm312_vm0, %v510_v39 }
 0x2f8 PF: > { %p15_p9 = scmp.ge.s32.totalorder %s877_s23, 4   ;;  %s1037_s18 = smov %s801_s19 }
 0x2f9   : > { %s1038_s19 = smov %s805_s20  ;;  %s1039_s20 = smov %s887_s26 }
 0x2fa   : > { %s1040_s21 = smov %s877_s23  ;;  %17 = sbr.rel (!%p15_p9) target bundleno = 3 (0x3), region = 109 }
 0x301   :  { %536 = vsyncpa [#allocation4], 1 }
 0x302   :  { %538 = vsyncpa [#allocation4 + $0x1], 1 }

</bundles_post_ra>
